<compile_context>
chip_gen: v6e
topology: v6e:2x2x1
jax: 0.10.0
libtpu: 0.0.40
codegen_flags: <defaults>
</compile_context>

<pallas_src>
import functools

import jax
import jax.numpy as jnp
from jax.experimental import pallas as pl
from jax.experimental.pallas import tpu as pltpu


def _intervention_kernel(base_ref, src_ref, w_ref, wt_ref, out_ref):
    # base/src tiles: (tm, D); w: (D, R); wt: (R, D) -- both resident in VMEM.
    # Difference in f32 on the VPU, then rounded to the MXU operand dtype
    # (bf16 when the IO dtype is bf16, f32 otherwise).
    d = src_ref[...].astype(jnp.float32) - base_ref[...].astype(jnp.float32)
    d = d.astype(w_ref.dtype)

    # (source - base) @ W  -> (tm, R), f32 accumulation on the MXU.
    r = jnp.dot(d, w_ref[...], preferred_element_type=jnp.float32)

    # r @ W.T with W.T pre-materialized (lane-dense along D) -> (tm, D).
    proj = jnp.dot(r.astype(wt_ref.dtype), wt_ref[...],
                   preferred_element_type=jnp.float32)

    # Re-read base only for the final add (don't keep its f32 upcast live
    # across both matmuls).
    out_ref[...] = (base_ref[...].astype(jnp.float32) + proj).astype(out_ref.dtype)


def _vmem_limit_bytes():
    """Scoped-VMEM limit: enough for big tiles, safe on v7x's 64 MiB VMEM."""
    try:
        cap = pltpu.get_tpu_info().vmem_capacity_bytes
    except Exception:
        cap = 64 << 20  # conservative: v7x physical VMEM per TC
    # Never exceed 64 MiB (v5e/v6e have plenty of headroom below 128 MiB,
    # v7x physical is 64 MiB -> effective 48 MiB after headroom), never go
    # below the usual 32 MiB default.
    return max(32 << 20, min(cap - (16 << 20), 64 << 20))


def _pick_tm(n_rows, embed_dim, low_rank, io_itemsize, mxu_itemsize, vmem_limit):
    """Largest row tile whose full VMEM footprint fits, capped at 512 rows."""
    budget = int(vmem_limit * 0.70)  # slack for semaphores / compiler scratch

    # Resident rotation matrices: W (D, R) lane-padded to >=128 lanes, and
    # W.T (R, D) sublane-padded to >=8 rows; assume double-buffered by the
    # pipeline (conservative).
    lanes_w = max(low_rank, 128)
    rows_wt = max(((low_rank + 7) // 8) * 8, 8)
    w_bytes = 2 * (embed_dim * lanes_w + rows_wt * embed_dim) * mxu_itemsize

    # Per-row cost of one grid step:
    #   3 IO streams (base, source, out), each double-buffered,
    #   + ~3 f32 rows of intermediates (difference, projection, base upcast).
    per_row = 3 * 2 * embed_dim * io_itemsize + 3 * embed_dim * 4

    tm = (budget - w_bytes) // max(per_row, 1)
    tm = max(8, min(int(tm), 512))     # >=256 rows already hits ~HBM roofline
    tm = (tm // 8) * 8                 # sublane-aligned

    # Keep at least 2 grid tiles when the problem allows it, so v7x's two
    # TensorCores both do useful work (harmless on 1-TC chips).
    half = ((pl.cdiv(n_rows, 2) + 7) // 8) * 8
    tm = max(8, min(tm, half))
    return tm


@functools.partial(jax.jit, static_argnames=("tm",))
def low_rank_rotated_space_intervention(base, source, weight, *, tm=None):
    """base, source: [..., D]; weight: [D, R] orthonormal columns. Returns [..., D]."""
    orig_shape = base.shape
    D = orig_shape[-1]
    Dw, R = weight.shape
    assert Dw == D

    base2d = base.reshape(-1, D)
    src2d = source.reshape(-1, D)
    N = base2d.shape[0]

    # MXU operand dtype: bf16 when IO is bf16 (native MXU rate, halves VMEM
    # footprint of W and the intermediates), f32 otherwise.
    mxu_dtype = jnp.bfloat16 if base.dtype == jnp.bfloat16 else jnp.float32
    w = weight.astype(mxu_dtype)          # (D, R), cast hoisted out of the grid loop
    wt = weight.T.astype(mxu_dtype)       # (R, D), precomputed transpose (lane-dense in D)

    vmem_limit = _vmem_limit_bytes()
    if tm is None:
        tm = _pick_tm(N, D, R,
                      jnp.dtype(base.dtype).itemsize,
                      jnp.dtype(mxu_dtype).itemsize,
                      vmem_limit)

    # No wrapper-side padding: Pallas masks the partial last block (purely
    # row-wise kernel, so garbage rows in the OOB region are never written).
    num_tiles = pl.cdiv(N, tm)

    out = pl.pallas_call(
        _intervention_kernel,
        out_shape=jax.ShapeDtypeStruct((N, D), base.dtype),
        grid_spec=pltpu.PrefetchScalarGridSpec(
            num_scalar_prefetch=0,
            grid=(num_tiles,),
            in_specs=[
                pl.BlockSpec((tm, D), lambda i: (i, 0)),   # base tile
                pl.BlockSpec((tm, D), lambda i: (i, 0)),   # source tile
                pl.BlockSpec((D, R), lambda i: (0, 0)),    # W   (resident, loop-invariant)
                pl.BlockSpec((R, D), lambda i: (0, 0)),    # W.T (resident, loop-invariant)
            ],
            out_specs=pl.BlockSpec((tm, D), lambda i: (i, 0)),
        ),
        compiler_params=pltpu.CompilerParams(
            dimension_semantics=("parallel",),
            vmem_limit_bytes=int(vmem_limit),
        ),
    )(base2d, src2d, w, wt)

    return out.reshape(orig_shape)


def make_orthogonal_weight(key, n, m, dtype=jnp.float32):
    """Orthonormal-column init (mimics nn.utils.parametrizations.orthogonal)."""
    a = jax.random.normal(key, (n, m), dtype=jnp.float32)
    q, _ = jnp.linalg.qr(a)
    return q.astype(dtype)


def reference_forward(base, source, weight):
    w = weight.astype(jnp.float32)
    rb = base.astype(jnp.float32) @ w
    rs = source.astype(jnp.float32) @ w
    return (base.astype(jnp.float32) + (rs - rb) @ w.T).astype(base.dtype)


# TODO(synk): compute_metrics path (intervention_norm / angular_change during
# training) is not implemented; only the forward mixed_output is produced.

if __name__ == "__main__":
    key = jax.random.PRNGKey(0)
    k_base, k_src, k_w = jax.random.split(key, 3)

    batch, seq, embed_dim, low_rank = 2, 8, 32, 4

    base = jax.random.normal(k_base, (batch, seq, embed_dim), dtype=jnp.float32)
    source = jax.random.normal(k_src, (batch, seq, embed_dim), dtype=jnp.float32)
    weight = make_orthogonal_weight(k_w, embed_dim, low_rank)

    out = low_rank_rotated_space_intervention(base, source, weight)
    jax.block_until_ready(out)

    ref = reference_forward(base.reshape(-1, embed_dim),
                            source.reshape(-1, embed_dim),
                            weight).reshape(batch, seq, embed_dim)

    assert out.shape == base.shape and out.dtype == base.dtype
    assert jnp.allclose(out, ref, atol=1e-4, rtol=1e-4)

    # Ragged row count (N not a multiple of the tile) -- exercises the
    # partial-last-block path (no wrapper padding anymore).
    base_r = jax.random.normal(k_base, (3, 5, embed_dim), dtype=jnp.float32)
    src_r = jax.random.normal(k_src, (3, 5, embed_dim), dtype=jnp.float32)
    out_r = low_rank_rotated_space_intervention(base_r, src_r, weight)
    jax.block_until_ready(out_r)
    ref_r = reference_forward(base_r.reshape(-1, embed_dim),
                              src_r.reshape(-1, embed_dim),
                              weight).reshape(3, 5, embed_dim)
    assert jnp.allclose(out_r, ref_r, atol=1e-4, rtol=1e-4)

    # bf16 IO path (MXU operands in bf16, f32 accumulation).
    base_b = base.astype(jnp.bfloat16)
    src_b = source.astype(jnp.bfloat16)
    out_b = low_rank_rotated_space_intervention(base_b, src_b, weight)
    jax.block_until_ready(out_b)
    ref_b = reference_forward(base_b.reshape(-1, embed_dim),
                              src_b.reshape(-1, embed_dim),
                              weight).reshape(batch, seq, embed_dim)
    assert out_b.dtype == jnp.bfloat16
    assert jnp.allclose(out_b.astype(jnp.float32), ref_b.astype(jnp.float32),
                        atol=3e-2, rtol=3e-2)

    print("KERNEL_OK")
</pallas_src>

<mosaic_0001>
module attributes {stable_mosaic.version = 11 : i64} {
  func.func @_intervention_kernel(%arg0: i32, %arg1: memref<8x32xf32, #tpu.memory_space<vmem>>, %arg2: memref<8x32xf32, #tpu.memory_space<vmem>>, %arg3: memref<32x4xf32, #tpu.memory_space<vmem>>, %arg4: memref<4x32xf32, #tpu.memory_space<vmem>>, %arg5: memref<8x32xf32, #tpu.memory_space<vmem>>) attributes {dimension_semantics = [#tpu.dimension_semantics<parallel>], iteration_bounds = array<i64: 2>, scalar_prefetch = 0 : i64, scratch_operands = 0 : i64, tpu.core_type = #tpu.core_type<tc>, window_params = [{transform_indices = @transform_0, window_bounds = array<i64: 8, 32>}, {transform_indices = @transform_1, window_bounds = array<i64: 8, 32>}, {pipeline_mode = #tpu.pipeline_mode<synchronous>, transform_indices = @transform_2, window_bounds = array<i64: 32, 4>}, {pipeline_mode = #tpu.pipeline_mode<synchronous>, transform_indices = @transform_3, window_bounds = array<i64: 4, 32>}, {transform_indices = @transform_4, window_bounds = array<i64: 8, 32>}]} {
    %c0 = arith.constant 0 : index
    %c0_0 = arith.constant 0 : index
    %0 = vector.load %arg2[%c0, %c0_0] : memref<8x32xf32, #tpu.memory_space<vmem>>, vector<8x32xf32>
    %c0_1 = arith.constant 0 : index
    %c0_2 = arith.constant 0 : index
    %1 = vector.load %arg1[%c0_1, %c0_2] : memref<8x32xf32, #tpu.memory_space<vmem>>, vector<8x32xf32>
    %2 = arith.subf %0, %1 : vector<8x32xf32>
    %c0_3 = arith.constant 0 : index
    %c0_4 = arith.constant 0 : index
    %3 = vector.load %arg3[%c0_3, %c0_4] : memref<32x4xf32, #tpu.memory_space<vmem>>, vector<32x4xf32>
    %cst = arith.constant dense<0.000000e+00> : vector<8x4xf32>
    %4 = tpu.matmul %2, %3, %cst {dimension_numbers = #tpu.dot_dimension_numbers<[1], [0], [0], [1], [0, 0, 1, 1], [], []>} : vector<8x32xf32>, vector<32x4xf32>, vector<8x4xf32> -> vector<8x4xf32>
    %c0_5 = arith.constant 0 : index
    %c0_6 = arith.constant 0 : index
    %5 = vector.load %arg4[%c0_5, %c0_6] : memref<4x32xf32, #tpu.memory_space<vmem>>, vector<4x32xf32>
    %cst_7 = arith.constant dense<0.000000e+00> : vector<8x32xf32>
    %6 = tpu.matmul %4, %5, %cst_7 {dimension_numbers = #tpu.dot_dimension_numbers<[1], [0], [0], [1], [0, 0, 1, 1], [], []>} : vector<8x4xf32>, vector<4x32xf32>, vector<8x32xf32> -> vector<8x32xf32>
    %c0_8 = arith.constant 0 : index
    %c0_9 = arith.constant 0 : index
    %7 = vector.load %arg1[%c0_8, %c0_9] : memref<8x32xf32, #tpu.memory_space<vmem>>, vector<8x32xf32>
    %8 = arith.addf %7, %6 : vector<8x32xf32>
    %c0_10 = arith.constant 0 : index
    %c0_11 = arith.constant 0 : index
    %9 = vector.load %arg5[%c0_10, %c0_11] : memref<8x32xf32, #tpu.memory_space<vmem>>, vector<8x32xf32>
    tpu.vector_store %arg5[%c0_10, %c0_11], %8 {strides = array<i32>} : memref<8x32xf32, #tpu.memory_space<vmem>>, vector<8x32xf32>,
    return
  }
  func.func @transform_0(%arg0: i32) -> (i32, i32) {
    %c0_i32 = arith.constant 0 : i32
    %c0_i32_0 = arith.constant 0 : i32
    return %arg0, %c0_i32 : i32, i32
  }
  func.func @transform_1(%arg0: i32) -> (i32, i32) {
    %c0_i32 = arith.constant 0 : i32
    %c0_i32_0 = arith.constant 0 : i32
    return %arg0, %c0_i32 : i32, i32
  }
  func.func @transform_2(%arg0: i32) -> (i32, i32) {
    %c0_i32 = arith.constant 0 : i32
    %c0_i32_0 = arith.constant 0 : i32
    %c0_i32_1 = arith.constant 0 : i32
    return %c0_i32, %c0_i32_0 : i32, i32
  }
  func.func @transform_3(%arg0: i32) -> (i32, i32) {
    %c0_i32 = arith.constant 0 : i32
    %c0_i32_0 = arith.constant 0 : i32
    %c0_i32_1 = arith.constant 0 : i32
    return %c0_i32, %c0_i32_0 : i32, i32
  }
  func.func @transform_4(%arg0: i32) -> (i32, i32) {
    %c0_i32 = arith.constant 0 : i32
    %c0_i32_0 = arith.constant 0 : i32
    return %arg0, %c0_i32 : i32, i32
  }
}

</mosaic_0001>

<bundles_post_ra>
// kernel: low_rank_rotated_space_intervention.1
= control target key start
LH: loop header
LB: loop body
LE: loop exit
PB: predicated region body
PF: predicated region fallthrough
CT: control target
= control target key end

     0   :  { %9 = vsyncpa [#allocation3], 0  ;;  %s738_s0 = inlined_call_operand.vmem [shape: f32[16,32], index: 0, kind: input, shape index: {}]   ;;  %s739_s1 = inlined_call_operand.vmem [shape: f32[16,32], index: 1, kind: input, shape index: {}]   ;;  %s740_s2 = inlined_call_operand.vmem [shape: f32[32,4], index: 2, kind: input, shape index: {}]   ;;  %s741_s3 = inlined_call_operand.vmem [shape: f32[4,32], index: 3, kind: input, shape index: {}]   ;;  %s742_s4 = inlined_call_operand.hbm [shape: f32[16,32], index: 4, kind: output, shape index: {}]  }
   0x1   :  { %11 = vsyncpa [#allocation3 + $0x1], 0  ;;  %s625_s15 = smov 0   ;;  %s627_s16 = smov 0  }
   0x2   :  { %s629_s17 = smov 0   ;;  %s631_s18 = smov 0  }
   0x3 LB: > { %s646_s19 = sadd.s32 4294967295, %s595_s18   ;;  %s457_s20 = sadd.s32 4294967294, %s595_s18   ;;  %s595_s18 = sphi %s631_s18, %s748_s18   ;;  %s591_s17 = sphi %s629_s17, %s747_s17   ;;  %s587_s16 = sphi %s627_s16, %s746_s16   ;;  %s583_s15 = sphi %s625_s15, %s745_s15  }
   0x4   : > { %s650_s21 = sadd.s32 1, %s595_s18   ;;  %s118_s22 = sadd.s32 1, %s591_s17 }
   0x5   : > { %s115_s23 = ssub.s32 %s595_s18, %s650_s21  ;;  %p128_p0 = scmp.ne.s32.totalorder %s591_s17, %s587_s16 }
   0x6   : > { %p116_p1 = scmp.eq.s32.totalorder %s115_s23, 0  ;;  %p129_p2 = scmp.eq.s32.totalorder %s646_s19, 1 }
   0x7   : > { %p134_p3 = scmp.ne.s32.totalorder %s587_s16, %s583_s15  ;;  %p135_p4 = scmp.eq.s32.totalorder %s457_s20, 1 }
   0x8   : > { %s661_s24 = scalar_select %p116_p1, %s591_s17, %s118_s22  }
   0x9   : > { %p663_p5 = por %p129_p2, %p128_p0  ;;  %p667_p6 = por %p135_p4, %p134_p3 }
   0xa   : > { %p460_p7 = scmp.ge.s32.totalorder %s595_s18, 1  ;;  %p173_p8 = scmp.lt.s32.totalorder %s595_s18, 3 }
   0xc   : > { %p174_p9 = pnand %p460_p7, %p173_p8 }
   0xd   : > { %p202_p10 = scmp.lt.s32.totalorder (!%p174_p9), %s646_s19, 1  ;;  %s199_s28 = sand.u32 (!%p174_p9), 1, %s587_s16  }
   0xe   : > { %177 = sbr.rel (%p174_p9) target bundleno = 429 (0x1ad), region = 36  ;;  %s461_s29 = sshll.u32 (!%p174_p9), %s199_s28, 3 }
   0xf   : > { %s468_s30 = sshll.u32 (!%p174_p9), %s646_s19, 7  ;;  %s373_s10 = scalar_lea.sflag (!%p174_p9), [#allocation3], %s199_s28 }
  0x10   : > { %s702_s9 = scalar_lea.hbm (!%p174_p9), %s742_s4, %s468_s30 }
  0x13   : > { %v216_v0 = vld [vmem:[%s740_s2 + $0x18] sm:$0xff]  ;;  %v597_v1 = vmov 0.0   ;;  %v215_v2 = vld [vmem:[%s740_s2 + $0x10] sm:$0xff]  ;;  %vm598_vm0 = vmmov 0   ;;  %s203_s5 = scalar_select %p202_p10, %s646_s19, 1  ;;  %v214_v3 = vld [vmem:[%s740_s2 + $0x8] sm:$0xff] }
  0x14   : > { %478 = vmatprep.subr.mxu0 %v597_v1  ;;  %486 = vmatprep.mubr.msk.f32.mxu0 %vm598_vm0, %v597_v1  ;;  %v213_v4 = vld [vmem:[%s740_s2] sm:$0xff]  ;;  %vm217_vm1 = vcmask 261120   ;;  %vm296_vm2 = vcmask 1043456   ;;  %vm292_vm3 = vcmask 31744   ;;  %s599_s19 = smov [#allocation2]  }
  0x15   : > { %479 = vmatpush3.msra.mxu0 %v216_v0  ;;  %489 = vmatprep.subr.mxu1 %v597_v1  ;;  %s462_s8 = sshll.u32 %s203_s5, 3  ;;  %v291_v8 = vld [vmem:[%s741_s3] sm:$0xf]  ;;  %s201_s5 = scalar_lea.vmem [#allocation2], %s461_s29 }
  0x16   : > { %480 = vmatprep.subr.mxu0 %v597_v1  ;;  %491 = vmatprep.mubr.msk.f32.mxu1 %vm598_vm0, %v597_v1  ;;  %s205_s13 = scalar_lea.vmem %s738_s0, %s462_s8  ;;  %s209_s22 = scalar_lea.vmem %s739_s1, %s462_s8 }
  0x17   : > { %481 = vmatpush3.msra.mxu0 %v215_v2  ;;  %v210_v5 = vld [vmem:[%s209_s22] sm:$0xff]  ;;  %490 = vmatpush3.msk.msra.mxu1 %vm296_vm2, %v291_v8  ;;  %s386_s6 = sshll.u32 %s201_s5, 4  ;;  %s539_s12 = sshll.u32 %s599_s19, 4  ;;  %s387_s6 = int_to_ptr.vmem [resolvable:$true] %s386_s6  ;;  %s540_s12 = int_to_ptr.vmem [resolvable:$false] %s539_s12 }
  0x18   : > { %482 = vmatprep.subr.mxu0 %v597_v1  ;;  %v211_v6 = vld [vmem:[%s205_s13] sm:$0xff]  ;;  %s535_s11 = scalar_lea.vmem %s387_s6, 128  ;;  %s541_s13 = scalar_lea.vmem %s540_s12, 256 }
  0x19   : > { %483 = vmatpush3.msra.mxu0 %v214_v3  ;;  %v212_v7 = vsub.f32 %v210_v5, %v211_v6  ;;  %p536_p11 = scmp.ne.s32.totalorder %s387_s6, %s535_s11  ;;  %p542_p0 = scmp.lt.s32.totalorder %s387_s6, %s540_s12 }
  0x1a   : > { %484 = vmatprep.subr.mxu0 %v597_v1  ;;  %p543_p1 = scmp.lt.s32.totalorder %s541_s13, %s535_s11 }
  0x1b   : > { %485 = vmatpush3.msra.mxu0 %v213_v4  ;;  %p537_p12 = pnand %p536_p11, %p663_p5 }
  0x1c   : > { %487 = vmatmul.mubr.msk.f32.vlgmr.msra.gmra.mxu0 %vm217_vm1, %v212_v7  ;;  %p544_p2 = por %p543_p1, %p542_p0 }
  0x1d   : > { %p538_p13 = pneg %p537_p12 }
  0x1f   : > { %p545_p3 = pnand %p544_p2, %p538_p13 }
  0xdc   : > { %v287_v9 = vpop.f32.mrf.mxu0 }
  0xdd   : > { %492 = vmatmul.mubr.msk.f32.vlgmr.msra.gmra.mxu1 %vm292_vm3, %v287_v9 }
  0xde   : > { %v488_v10 = vpop.f32.mrf.mxu0 }
 0x19d   : > { %v366_v11 = vpop.f32.mrf.mxu1 }
 0x19e   : > { %v370_v12 = vadd.f32 %v366_v11, %v211_v6 }
 0x19f   : > { %v493_v13 = vpop.f32.mrf.mxu1 }
 0x1a0   : > { %371 = vst.msk [vmem:[%s201_s5] sm:$0xff] %vm217_vm1, %v370_v12 }
 0x1a1   : > { %548 = shalt.err (!%p545_p3)
}
 0x1a2   : > { %s549_s14 = scalar_lea.hbm %s702_s9, 128  ;;  %s553_s23 = scalar_lea.hbm %s742_s4, 256 }
 0x1a3   : > { %p550_p4 = scmp.ne.s32.totalorder %s702_s9, %s549_s14  ;;  %p554_p9 = scmp.lt.s32.totalorder %s702_s9, %s742_s4 }
 0x1a4   : > { %p555_p10 = scmp.lt.s32.totalorder %s553_s23, %s549_s14 }
 0x1a5   : > { %p551_p7 = pnand %p550_p4, %p663_p5 }
 0x1a6   : > { %p556_p11 = por %p555_p10, %p554_p9 }
 0x1a7   : > { %p552_p8 = pneg %p551_p7 }
 0x1a9   : > { %p557_p12 = pnand %p556_p11, %p552_p8 }
 0x1ab   : > { %560 = shalt.err (!%p557_p12)
}
 0x1ac   : > { %494 = dma.vmem_to_hbm [thread:$0]  (%p663_p5), %s387_s6, 128, %s702_s9, %s373_s10  }
 0x1ad PF: > { %p500_p13 = scmp.ge.s32.totalorder %s595_s18, 2  ;;  %s398_s29 = sand.u32 1, %s583_s15  }
 0x1ae   : > { %s399_s30 = scalar_lea.sflag [#allocation3], %s398_s29 }
 0x1af   : > { %p497_p0 = pnand %p500_p13, %p667_p6 }
 0x1b1   : > { %p498_p1 = pneg %p497_p0 }
 0x1b3   : > { %578 = dma.done.wait (%p498_p1), %s399_s30, 128  }
 0x1b4   : > { %580 = vsyncadd (%p498_p1), %s399_s30, 4294967168  ;;  %p14_p2 = scmp.ge.s32.totalorder %s650_s21, 4   ;;  %s745_s15 = smov %s587_s16 }
 0x1b5   : > { %s746_s16 = smov %s591_s17  ;;  %s747_s17 = smov %s661_s24 }
 0x1b6   : > { %s748_s18 = smov %s650_s21  ;;  %16 = sbr.rel (!%p14_p2) target bundleno = 3 (0x3), region = 74 }
 0x1bb   :  { %404 = vsyncpa [#allocation3], 1 }
 0x1bc   :  { %406 = vsyncpa [#allocation3 + $0x1], 1 }

</bundles_post_ra>
